<compile_context>
chip_gen: v7x
topology: tpu7x:2x2x1
jax: 0.10.0
libtpu: 0.0.40
codegen_flags: <defaults>
</compile_context>

<pallas_src>
import functools

import jax
import jax.numpy as jnp
from jax.experimental import pallas as pl
from jax.experimental.pallas import tpu as pltpu

_OUT_PAD = 128          # lane-dense output width (real out_dim = 2, zero-padded)
_MAX_ROW_TILE = 512     # f32 row tile: ~85% of HBM roofline per measured data


def _mlp_kernel(x_ref, w1_ref, b1_ref, w2_ref, b2_ref, o_ref):
    # fc1: [TB, D_in] @ [D_in, H] + [1, H], then ReLU.
    h = jnp.dot(x_ref[...], w1_ref[...], preferred_element_type=jnp.float32)
    h = jnp.maximum(h + b1_ref[...], 0.0)
    # fc2 (lane-padded): [TB, H] @ [H, 128] + [1, 128].
    out = jnp.dot(h, w2_ref[...], preferred_element_type=jnp.float32) + b2_ref[...]
    o_ref[...] = out.astype(o_ref.dtype)


def _round_up(n, m):
    return ((n + m - 1) // m) * m


@jax.jit
def meta_learner_forward(x, w1_t, b1, w2_t, b2):
    """x: [B, input_dim]; w1_t: [input_dim, hidden]; b1: [1, hidden];
    w2_t: [hidden, out_dim]; b2: [1, out_dim]  ->  [B, out_dim]"""
    B, d_in = x.shape
    hidden = w1_t.shape[1]
    out_dim = w2_t.shape[1]

    # Row tile: big enough to amortize per-step overhead, multiple of 8 sublanes.
    tb = _MAX_ROW_TILE if B >= _MAX_ROW_TILE else _round_up(B, 8)
    b_pad = _round_up(B, tb)
    if b_pad != B:
        x = jnp.pad(x, ((0, b_pad - B), (0, 0)))

    # Lane-dense output: zero-pad fc2 weight/bias to 128 output lanes.
    w2_p = jnp.pad(w2_t, ((0, 0), (0, _OUT_PAD - out_dim)))
    b2_p = jnp.pad(b2, ((0, 0), (0, _OUT_PAD - out_dim)))

    grid = (b_pad // tb,)
    flops = 2 * b_pad * (d_in * hidden + hidden * _OUT_PAD)
    bytes_accessed = 4 * (
        b_pad * d_in + d_in * hidden + hidden + hidden * _OUT_PAD + _OUT_PAD
        + b_pad * _OUT_PAD
    )

    out_padded = pl.pallas_call(
        _mlp_kernel,
        out_shape=jax.ShapeDtypeStruct((b_pad, _OUT_PAD), jnp.float32),
        grid=grid,
        in_specs=[
            pl.BlockSpec((tb, d_in), lambda i: (i, 0)),          # x tile
            pl.BlockSpec((d_in, hidden), lambda i: (0, 0)),      # w1 (resident)
            pl.BlockSpec((1, hidden), lambda i: (0, 0)),         # b1 (resident)
            pl.BlockSpec((hidden, _OUT_PAD), lambda i: (0, 0)),  # w2 padded
            pl.BlockSpec((1, _OUT_PAD), lambda i: (0, 0)),       # b2 padded
        ],
        out_specs=pl.BlockSpec((tb, _OUT_PAD), lambda i: (i, 0)),
        compiler_params=pltpu.CompilerParams(
            dimension_semantics=("parallel",)),
        cost_estimate=pl.CostEstimate(
            flops=flops, transcendentals=0, bytes_accessed=bytes_accessed),
    )(x, w1_t, b1, w2_p, b2_p)

    return out_padded[:B, :out_dim]


def init_params(key, input_dim, hidden_dim):
    """Deterministic init mirroring PyTorch nn.Linear default
    (uniform in [-1/sqrt(fan_in), 1/sqrt(fan_in)]), weights stored transposed."""
    k1, k2, k3, k4 = jax.random.split(key, 4)
    lim1 = 1.0 / jnp.sqrt(jnp.float32(input_dim))
    lim2 = 1.0 / jnp.sqrt(jnp.float32(hidden_dim))
    w1_t = jax.random.uniform(k1, (input_dim, hidden_dim), jnp.float32, -lim1, lim1)
    b1 = jax.random.uniform(k2, (1, hidden_dim), jnp.float32, -lim1, lim1)
    w2_t = jax.random.uniform(k3, (hidden_dim, 2), jnp.float32, -lim2, lim2)
    b2 = jax.random.uniform(k4, (1, 2), jnp.float32, -lim2, lim2)
    return w1_t, b1, w2_t, b2


def _reference(x, w1_t, b1, w2_t, b2):
    return jnp.maximum(x @ w1_t + b1, 0.0) @ w2_t + b2


if __name__ == "__main__":
    INPUT_DIM, HIDDEN_DIM = 16, 32
    key = jax.random.PRNGKey(0)
    kx1, kx2, kp = jax.random.split(key, 3)
    w1_t, b1, w2_t, b2 = init_params(kp, INPUT_DIM, HIDDEN_DIM)

    # Small-shape check (batch=8, matching the module's typical tiny input).
    x_small = jax.random.normal(kx1, (8, INPUT_DIM), jnp.float32)
    out_small = jax.block_until_ready(
        meta_learner_forward(x_small, w1_t, b1, w2_t, b2))
    assert out_small.shape == (8, 2)
    assert jnp.allclose(out_small, _reference(x_small, w1_t, b1, w2_t, b2),
                        atol=1e-5, rtol=1e-5)

    # Larger batch exercises the row-tile grid (2 grid steps, padded batch).
    x_big = jax.random.normal(kx2, (640, INPUT_DIM), jnp.float32)
    out_big = jax.block_until_ready(
        meta_learner_forward(x_big, w1_t, b1, w2_t, b2))
    assert out_big.shape == (640, 2)
    assert jnp.allclose(out_big, _reference(x_big, w1_t, b1, w2_t, b2),
                        atol=1e-5, rtol=1e-5)

    print("KERNEL_OK")
</pallas_src>

<mosaic_0001>
module attributes {stable_mosaic.version = 11 : i64} {
  func.func @_mlp_kernel(%arg0: i32, %arg1: memref<8x16xf32, #tpu.memory_space<vmem>>, %arg2: memref<16x32xf32, #tpu.memory_space<vmem>>, %arg3: memref<1x32xf32, #tpu.memory_space<vmem>>, %arg4: memref<32x128xf32, #tpu.memory_space<vmem>>, %arg5: memref<1x128xf32, #tpu.memory_space<vmem>>, %arg6: memref<8x128xf32, #tpu.memory_space<vmem>>) attributes {dimension_semantics = [#tpu.dimension_semantics<parallel>], iteration_bounds = array<i64: 1>, scalar_prefetch = 0 : i64, scratch_operands = 0 : i64, tpu.core_type = #tpu.core_type<tc>, window_params = [{transform_indices = @transform_0, window_bounds = array<i64: 8, 16>}, {pipeline_mode = #tpu.pipeline_mode<synchronous>, transform_indices = @transform_1, window_bounds = array<i64: 16, 32>}, {pipeline_mode = #tpu.pipeline_mode<synchronous>, transform_indices = @transform_2, window_bounds = array<i64: 1, 32>}, {pipeline_mode = #tpu.pipeline_mode<synchronous>, transform_indices = @transform_3, window_bounds = array<i64: 32, 128>}, {pipeline_mode = #tpu.pipeline_mode<synchronous>, transform_indices = @transform_4, window_bounds = array<i64: 1, 128>}, {transform_indices = @transform_5, window_bounds = array<i64: 8, 128>}]} {
    %c0 = arith.constant 0 : index
    %c0_0 = arith.constant 0 : index
    %0 = vector.load %arg1[%c0, %c0_0] : memref<8x16xf32, #tpu.memory_space<vmem>>, vector<8x16xf32>
    %c0_1 = arith.constant 0 : index
    %c0_2 = arith.constant 0 : index
    %1 = vector.load %arg2[%c0_1, %c0_2] : memref<16x32xf32, #tpu.memory_space<vmem>>, vector<16x32xf32>
    %cst = arith.constant dense<0.000000e+00> : vector<8x32xf32>
    %2 = tpu.matmul %0, %1, %cst {dimension_numbers = #tpu.dot_dimension_numbers<[1], [0], [0], [1], [0, 0, 1, 1], [], []>} : vector<8x16xf32>, vector<16x32xf32>, vector<8x32xf32> -> vector<8x32xf32>
    %c0_3 = arith.constant 0 : index
    %c0_4 = arith.constant 0 : index
    %3 = vector.load %arg3[%c0_3, %c0_4] : memref<1x32xf32, #tpu.memory_space<vmem>>, vector<1x32xf32>
    %4 = vector.broadcast %3 : vector<1x32xf32> to vector<8x32xf32>
    %5 = arith.addf %2, %4 : vector<8x32xf32>
    %cst_5 = arith.constant 0.000000e+00 : f32
    %6 = vector.broadcast %cst_5 : f32 to vector<8x32xf32>
    %7 = arith.maximumf %5, %6 : vector<8x32xf32>
    %c0_6 = arith.constant 0 : index
    %c0_7 = arith.constant 0 : index
    %8 = vector.load %arg4[%c0_6, %c0_7] : memref<32x128xf32, #tpu.memory_space<vmem>>, vector<32x128xf32>
    %cst_8 = arith.constant dense<0.000000e+00> : vector<8x128xf32>
    %9 = tpu.matmul %7, %8, %cst_8 {dimension_numbers = #tpu.dot_dimension_numbers<[1], [0], [0], [1], [0, 0, 1, 1], [], []>} : vector<8x32xf32>, vector<32x128xf32>, vector<8x128xf32> -> vector<8x128xf32>
    %c0_9 = arith.constant 0 : index
    %c0_10 = arith.constant 0 : index
    %10 = vector.load %arg5[%c0_9, %c0_10] : memref<1x128xf32, #tpu.memory_space<vmem>>, vector<1x128xf32>
    %11 = vector.broadcast %10 : vector<1x128xf32> to vector<8x128xf32>
    %12 = arith.addf %9, %11 : vector<8x128xf32>
    %c0_11 = arith.constant 0 : index
    %c0_12 = arith.constant 0 : index
    %13 = vector.load %arg6[%c0_11, %c0_12] : memref<8x128xf32, #tpu.memory_space<vmem>>, vector<8x128xf32>
    tpu.vector_store %arg6[%c0_11, %c0_12], %12 {strides = array<i32>} : memref<8x128xf32, #tpu.memory_space<vmem>>, vector<8x128xf32>,
    return
  }
  func.func @transform_0(%arg0: i32) -> (i32, i32) {
    %c0_i32 = arith.constant 0 : i32
    %c0_i32_0 = arith.constant 0 : i32
    return %arg0, %c0_i32 : i32, i32
  }
  func.func @transform_1(%arg0: i32) -> (i32, i32) {
    %c0_i32 = arith.constant 0 : i32
    %c0_i32_0 = arith.constant 0 : i32
    %c0_i32_1 = arith.constant 0 : i32
    return %c0_i32, %c0_i32_0 : i32, i32
  }
  func.func @transform_2(%arg0: i32) -> (i32, i32) {
    %c0_i32 = arith.constant 0 : i32
    %c0_i32_0 = arith.constant 0 : i32
    %c0_i32_1 = arith.constant 0 : i32
    return %c0_i32, %c0_i32_0 : i32, i32
  }
  func.func @transform_3(%arg0: i32) -> (i32, i32) {
    %c0_i32 = arith.constant 0 : i32
    %c0_i32_0 = arith.constant 0 : i32
    %c0_i32_1 = arith.constant 0 : i32
    return %c0_i32, %c0_i32_0 : i32, i32
  }
  func.func @transform_4(%arg0: i32) -> (i32, i32) {
    %c0_i32 = arith.constant 0 : i32
    %c0_i32_0 = arith.constant 0 : i32
    %c0_i32_1 = arith.constant 0 : i32
    return %c0_i32, %c0_i32_0 : i32, i32
  }
  func.func @transform_5(%arg0: i32) -> (i32, i32) {
    %c0_i32 = arith.constant 0 : i32
    %c0_i32_0 = arith.constant 0 : i32
    return %arg0, %c0_i32 : i32, i32
  }
}

</mosaic_0001>

<bundles_post_ra>
// kernel: meta_learner_forward.1
= control target key start
LH: loop header
LB: loop body
LE: loop exit
PB: predicated region body
PF: predicated region fallthrough
CT: control target
= control target key end

     0   :  { %v237_v0 = vmov 0.0|0.0   ;;  %vm238_vm0 = vmmov 0   ;;  %v239_v3 = vmov 0.0   ;;  %vm30_vm1 = vcmask 130048   ;;  %s300_s1 = inlined_call_operand.vmem [shape: f32[16,32], index: 1, kind: input, shape index: {}]   ;;  %s301_s3 = inlined_call_operand.vmem [shape: f32[32,128], index: 3, kind: input, shape index: {}]   ;;  %s302_s0 = inlined_call_operand.vmem [shape: f32[8,16], index: 0, kind: input, shape index: {}]   ;;  %s303_s2 = inlined_call_operand.vmem [shape: f32[1,32], index: 2, kind: input, shape index: {}]   ;;  %s304_s4 = inlined_call_operand.vmem [shape: f32[1,128], index: 4, kind: input, shape index: {}]   ;;  %s305_s5 = inlined_call_operand.vmem [shape: f32[8,128], index: 5, kind: output, shape index: {}]  }
   0x1   :  { %225 = vmatprep.subr.bf16.mxu0 %v237_v0  ;;  %v21_v1 = vld [vmem:[%s300_s1] sm:$0xff]  ;;  %v22_v2 = vld [vmem:[%s300_s1 + $0x8] sm:$0xff]  ;;  %211 = vmatprep.mubr.msk.f32.mxu0 %vm238_vm0, %v239_v3  ;;  %v107_v9 = vld [vmem:[%s301_s3 + $0x10] sm:$0xff]  ;;  %vm116_vm2 = vcmask 261120  }
   0x2   :  { %v226_v4 = vpack.c.bf16 %v22_v2, %v21_v1  ;;  %228 = vmatprep.subr.bf16.mxu1 %v237_v0  ;;  %v105_v5 = vld [vmem:[%s301_s3] sm:$0xff]  ;;  %v106_v6 = vld [vmem:[%s301_s3 + $0x8] sm:$0xff]  ;;  %222 = vmatprep.mubr.msk.f32.mxu1 %vm238_vm0, %v239_v3  ;;  %v108_v10 = vld [vmem:[%s301_s3 + $0x18] sm:$0xff] }
   0x3   :  { %v229_v7 = vpack.c.bf16 %v106_v6, %v105_v5  ;;  %v20_v8 = vld [vmem:[%s302_s0] sm:$0xff]  ;;  %v232_v11 = vpack.c.bf16 %v108_v10, %v107_v9 }
   0x4   :  { %227 = vmatpush3.bf16.msra.mxu0 %v226_v4  ;;  %v195_v12 = vld [vmem:[%s303_s2] ss:$0 sm:$0xff] }
   0x5   :  { %230 = vmatpush3.bf16.msra.mxu1 %v229_v7  ;;  %v197_v17 = vld [vmem:[%s304_s4] ss:$0 sm:$0xff] }
   0x6   :  { %231 = vmatprep.subr.bf16.mxu1 %v237_v0 }
   0x7   :  { %212 = vmatmul.mubr.msk.f32.vlgmr.msra.gmra.mrb[0].mxu0 %vm30_vm1, %v20_v8 }
   0x9   :  { %233 = vmatpush3.bf16.msra.mxu1 %v232_v11 }
  0xda   :  { %v100_v13 = vpop.f32.mrb[0].mxu0 }
  0xdb   :  { %v101_v14 = vadd.f32 %v195_v12, %v100_v13  ;;  %v213_v15 = vpop.f32.mrb[1].mxu0 }
  0xdd   :  { %v104_v16 = vmax.f32 %v101_v14, 0.0 }
  0xdf   :  { %223 = vmatmul.mubr.msk.f32.vlgmr.msra.gmra.mrb[0].mxu1 %vm116_vm2, %v104_v16 }
 0x1b2   :  { %v186_v18 = vpop.f32.mrb[0].mxu1 }
 0x1b3   :  { %v187_v19 = vadd.f32 %v197_v17, %v186_v18  ;;  %v224_v20 = vpop.f32.mrb[1].mxu1 }
 0x1b5   :  { %190 = vst [vmem:[%s305_s5] sm:$0xff] %v187_v19 }

</bundles_post_ra>
